<compile_context>
chip_gen: v5e
topology: v5e:2x2
jax: 0.10.0
libtpu: 0.0.40
codegen_flags: <defaults>
</compile_context>

<pallas_src>
import functools

import jax
import jax.numpy as jnp
from jax.experimental import pallas as pl
from jax.experimental.pallas import tpu as pltpu


def _round_up(x, m):
    return ((x + m - 1) // m) * m


def _tpu_vmem_capacity_bytes():
    """Per-core VMEM capacity; conservative fallback if the query is unavailable."""
    try:
        return int(pltpu.get_tpu_info().vmem_capacity_bytes)
    except Exception:
        return 64 << 20  # v7x per-TC VMEM (smallest of current gens)


def _supports_bf16_vpu():
    """v6e/v7x have bf16 VALUs; v5e and older do not (keep f32 epilogue there)."""
    try:
        info = pltpu.get_tpu_info()
        for attr in ("chip_version", "version", "chip_name", "name"):
            v = getattr(info, attr, None)
            if v is not None:
                s = str(v).lower()
                if any(t in s for t in ("v2", "v3", "v4", "v5")) or s in ("2", "3", "4", "5"):
                    return False
                return True
    except Exception:
        pass
    return True  # default to modern chips (v6e/v7x)


def mlp_kernel(x_ref, w1_ref, b1_ref, w2_ref, b2_ref, w3_ref, b3_ref, o_ref):
    """Fused 3-layer MLP on one batch tile (all weights resident in VMEM).

    Epilogue (bias-add + relu) dtype follows the bias dtype: the wrapper passes bf16
    biases on chips with bf16 VALUs and f32 biases otherwise.  MXU accumulation is f32.
    """
    x = x_ref[...]

    # fc_1 + (dropout == identity in eval mode) + relu
    # TODO(synk): training-mode dropout (pltpu.prng_* Bernoulli mask) not emitted.
    h = jnp.dot(x, w1_ref[...], preferred_element_type=jnp.float32)
    h = h.astype(b1_ref.dtype) + b1_ref[...]
    h = jnp.maximum(h, 0).astype(w2_ref.dtype)

    # fc_2 + relu
    h = jnp.dot(h, w2_ref[...], preferred_element_type=jnp.float32)
    h = h.astype(b2_ref.dtype) + b2_ref[...]
    h = jnp.maximum(h, 0).astype(w3_ref.dtype)

    # fc_3  (reference's `self.fc_(x)` typo -> intended fc_3)
    y = jnp.dot(h, w3_ref[...], preferred_element_type=jnp.float32)
    y = y.astype(b3_ref.dtype) + b3_ref[...]
    o_ref[...] = y.astype(o_ref.dtype)


@functools.partial(jax.jit, static_argnames=("batch_tile",))
def mlp_forward(x, w1, b1, w2, b2, w3, b3, *, batch_tile=512):
    B, D_in = x.shape
    H = w1.shape[1]
    D_out = w3.shape[1]
    compute_dtype = x.dtype
    itemsize = jnp.dtype(compute_dtype).itemsize

    # Lane-dense padding (multiples of 128) ONLY for hidden/output dims (intermediate
    # lane axes and the stored output).  x's feature dim stays unpadded: a full-extent
    # block is legal and avoids an HBM-rewriting pad + inflated per-step input DMA.
    H_p = _round_up(H, 128)
    D_out_p = _round_up(D_out, 128)

    # Balanced batch tiling, aligned to the dtype's packed sublane multiple, with
    # >=2 grid steps whenever possible so "parallel" keeps both v7x TCs busy.
    sublane = max(8, 32 // itemsize)          # f32:8, bf16:16, int8/fp8:32
    n_steps = max(1, pl.cdiv(B, int(batch_tile)))
    if n_steps < 2 and B > sublane:
        n_steps = 2
    bt = _round_up(pl.cdiv(B, n_steps), sublane)
    B_p = _round_up(B, bt)
    grid = (B_p // bt,)

    # Epilogue dtype: bf16 bias-add/relu on bf16-VPU chips when computing in bf16.
    use_bf16_epi = (jnp.dtype(compute_dtype) == jnp.dtype(jnp.bfloat16)) and _supports_bf16_vpu()
    epi_dtype = compute_dtype if use_bf16_epi else jnp.float32
    b_itemsize = jnp.dtype(epi_dtype).itemsize

    x_p = jnp.pad(x, ((0, B_p - B), (0, 0)))                         # batch pad only
    w1_p = jnp.pad(w1.astype(compute_dtype), ((0, 0), (0, H_p - H)))
    w2_p = jnp.pad(w2.astype(compute_dtype), ((0, H_p - H), (0, H_p - H)))
    w3_p = jnp.pad(w3.astype(compute_dtype), ((0, H_p - H), (0, D_out_p - D_out)))
    b1_p = jnp.pad(b1.astype(epi_dtype).reshape(1, -1), ((0, 0), (0, H_p - H)))
    b2_p = jnp.pad(b2.astype(epi_dtype).reshape(1, -1), ((0, 0), (0, H_p - H)))
    b3_p = jnp.pad(b3.astype(epi_dtype).reshape(1, -1), ((0, 0), (0, D_out_p - D_out)))

    # VMEM budget: double-buffered x/out tiles + single-buffered resident weights/biases
    # + fused intermediates (f32 accumulator + compute-dtype recast of h, x2 layers).
    # Cap is generation-aware (~75% of this chip's VMEM).
    w_bytes = (D_in * H_p + H_p * H_p + H_p * D_out_p) * itemsize
    b_bytes = (2 * H_p + D_out_p) * b_itemsize
    io_tile_bytes = bt * (D_in + D_out_p) * itemsize
    act_bytes = 2 * bt * H_p * (4 + itemsize)
    vmem_needed = 2 * io_tile_bytes + (w_bytes + b_bytes) + act_bytes
    vmem_cap = (_tpu_vmem_capacity_bytes() * 3) // 4
    vmem_limit = int(min(max(vmem_needed * 5 // 4 + (2 << 20), 16 << 20), vmem_cap))
    # TODO(synk): when w_bytes exceeds ~vmem_cap/3 (e.g. bf16 hidden_dim >= ~4K on v7x),
    # fall back to a hidden-dim (K)-tiled grid with an f32 accumulator scratch instead
    # of the all-weights-resident layout.

    flops = 2 * B_p * (D_in * H_p + H_p * H_p + H_p * D_out_p)
    bytes_accessed = int(B_p * (D_in + D_out_p) * itemsize + w_bytes + b_bytes)

    resident = pl.Buffered(1)  # single-buffer grid-invariant inputs

    out_p = pl.pallas_call(
        mlp_kernel,
        out_shape=jax.ShapeDtypeStruct((B_p, D_out_p), compute_dtype),
        grid_spec=pltpu.PrefetchScalarGridSpec(
            num_scalar_prefetch=0,
            grid=grid,
            in_specs=[
                pl.BlockSpec((bt, D_in), lambda i: (i, 0)),                             # x tile (unpadded features)
                pl.BlockSpec((D_in, H_p), lambda i: (0, 0), pipeline_mode=resident),    # W1
                pl.BlockSpec((1, H_p), lambda i: (0, 0), pipeline_mode=resident),       # b1
                pl.BlockSpec((H_p, H_p), lambda i: (0, 0), pipeline_mode=resident),     # W2
                pl.BlockSpec((1, H_p), lambda i: (0, 0), pipeline_mode=resident),       # b2
                pl.BlockSpec((H_p, D_out_p), lambda i: (0, 0), pipeline_mode=resident), # W3
                pl.BlockSpec((1, D_out_p), lambda i: (0, 0), pipeline_mode=resident),   # b3
            ],
            out_specs=pl.BlockSpec((bt, D_out_p), lambda i: (i, 0)),                    # lane-dense output
        ),
        compiler_params=pltpu.CompilerParams(
            dimension_semantics=("parallel",),
            vmem_limit_bytes=vmem_limit,
        ),
        cost_estimate=pl.CostEstimate(
            flops=flops, transcendentals=0, bytes_accessed=bytes_accessed),
    )(x_p, w1_p, b1_p, w2_p, b2_p, w3_p, b3_p)

    # strip batch / lane padding
    return out_p[:B, :D_out]


def init_linear_params(key, fan_in, fan_out, dtype=jnp.float32):
    """Deterministic PyTorch-nn.Linear-style init: U(-1/sqrt(fan_in), 1/sqrt(fan_in))."""
    kw, kb = jax.random.split(key)
    bound = 1.0 / jnp.sqrt(jnp.asarray(fan_in, dtype))
    # stored as [in, out] (transposed relative to PyTorch's [out, in])
    w = jax.random.uniform(kw, (fan_in, fan_out), dtype, -bound, bound)
    b = jax.random.uniform(kb, (1, fan_out), dtype, -bound, bound)
    return w, b


def mlp_reference(x, w1, b1, w2, b2, w3, b3):
    h = jnp.maximum(x @ w1 + b1, 0.0)   # dropout == identity (eval)
    h = jnp.maximum(h @ w2 + b2, 0.0)
    return h @ w3 + b3


if __name__ == "__main__":
    # Shapes consistent with the module: input_dim=16, hidden_dim=32, output_dim=8.
    # batch=256 with the default batch_tile -> auto-balanced 2-step "parallel" grid.
    B, D_IN, HID, D_OUT = 256, 16, 32, 8

    key = jax.random.PRNGKey(0)
    kx, k1, k2, k3 = jax.random.split(key, 4)

    x = jax.random.normal(kx, (B, D_IN), jnp.float32)
    w1, b1 = init_linear_params(k1, D_IN, HID)
    w2, b2 = init_linear_params(k2, HID, HID)
    w3, b3 = init_linear_params(k3, HID, D_OUT)

    # ---- f32 path (tight tolerance vs reference)
    out = mlp_forward(x, w1, b1, w2, b2, w3, b3)
    out = jax.block_until_ready(out)
    ref = mlp_reference(x, w1, b1, w2, b2, w3, b3)
    assert out.shape == (B, D_OUT), out.shape
    assert jnp.allclose(out, ref, atol=1e-5, rtol=1e-5), "Pallas f32 output != reference"

    # ---- bf16 weights/activations path (f32 MXU accumulation; bf16 epilogue on v6e/v7x)
    x_bf = x.astype(jnp.bfloat16)
    w1_bf, w2_bf, w3_bf = (w.astype(jnp.bfloat16) for w in (w1, w2, w3))
    out_bf = mlp_forward(x_bf, w1_bf, b1, w2_bf, b2, w3_bf, b3)
    out_bf = jax.block_until_ready(out_bf)
    ref_bf = mlp_reference(x_bf.astype(jnp.float32),
                           w1_bf.astype(jnp.float32), b1,
                           w2_bf.astype(jnp.float32), b2,
                           w3_bf.astype(jnp.float32), b3)
    assert out_bf.shape == (B, D_OUT), out_bf.shape
    assert jnp.allclose(out_bf.astype(jnp.float32), ref_bf, atol=5e-2, rtol=5e-2), \
        "Pallas bf16 output != reference"

    print("KERNEL_OK")
</pallas_src>

<mosaic_0001>
module attributes {stable_mosaic.version = 11 : i64} {
  func.func @mlp_kernel(%arg0: i32, %arg1: memref<128x16xf32, #tpu.memory_space<vmem>>, %arg2: memref<16x128xf32, #tpu.memory_space<vmem>>, %arg3: memref<1x128xf32, #tpu.memory_space<vmem>>, %arg4: memref<128x128xf32, #tpu.memory_space<vmem>>, %arg5: memref<1x128xf32, #tpu.memory_space<vmem>>, %arg6: memref<128x128xf32, #tpu.memory_space<vmem>>, %arg7: memref<1x128xf32, #tpu.memory_space<vmem>>, %arg8: memref<128x128xf32, #tpu.memory_space<vmem>>) attributes {dimension_semantics = [#tpu.dimension_semantics<parallel>], iteration_bounds = array<i64: 2>, scalar_prefetch = 0 : i64, scratch_operands = 0 : i64, tpu.core_type = #tpu.core_type<tc>, window_params = [{transform_indices = @transform_0, window_bounds = array<i64: 128, 16>}, {pipeline_mode = #tpu.pipeline_mode<synchronous>, transform_indices = @transform_1, window_bounds = array<i64: 16, 128>}, {pipeline_mode = #tpu.pipeline_mode<synchronous>, transform_indices = @transform_2, window_bounds = array<i64: 1, 128>}, {pipeline_mode = #tpu.pipeline_mode<synchronous>, transform_indices = @transform_3, window_bounds = array<i64: 128, 128>}, {pipeline_mode = #tpu.pipeline_mode<synchronous>, transform_indices = @transform_4, window_bounds = array<i64: 1, 128>}, {pipeline_mode = #tpu.pipeline_mode<synchronous>, transform_indices = @transform_5, window_bounds = array<i64: 128, 128>}, {pipeline_mode = #tpu.pipeline_mode<synchronous>, transform_indices = @transform_6, window_bounds = array<i64: 1, 128>}, {transform_indices = @transform_7, window_bounds = array<i64: 128, 128>}]} {
    %c0 = arith.constant 0 : index
    %c0_0 = arith.constant 0 : index
    %0 = vector.load %arg1[%c0, %c0_0] : memref<128x16xf32, #tpu.memory_space<vmem>>, vector<128x16xf32>
    %c0_1 = arith.constant 0 : index
    %c0_2 = arith.constant 0 : index
    %1 = vector.load %arg2[%c0_1, %c0_2] : memref<16x128xf32, #tpu.memory_space<vmem>>, vector<16x128xf32>
    %cst = arith.constant dense<0.000000e+00> : vector<128x128xf32>
    %2 = tpu.matmul %0, %1, %cst {dimension_numbers = #tpu.dot_dimension_numbers<[1], [0], [0], [1], [0, 0, 1, 1], [], []>} : vector<128x16xf32>, vector<16x128xf32>, vector<128x128xf32> -> vector<128x128xf32>
    %c0_3 = arith.constant 0 : index
    %c0_4 = arith.constant 0 : index
    %3 = vector.load %arg3[%c0_3, %c0_4] : memref<1x128xf32, #tpu.memory_space<vmem>>, vector<1x128xf32>
    %4 = vector.broadcast %3 : vector<1x128xf32> to vector<128x128xf32>
    %5 = arith.addf %2, %4 : vector<128x128xf32>
    %cst_5 = arith.constant 0.000000e+00 : f32
    %6 = vector.broadcast %cst_5 : f32 to vector<128x128xf32>
    %7 = arith.maximumf %5, %6 : vector<128x128xf32>
    %c0_6 = arith.constant 0 : index
    %c0_7 = arith.constant 0 : index
    %8 = vector.load %arg4[%c0_6, %c0_7] : memref<128x128xf32, #tpu.memory_space<vmem>>, vector<128x128xf32>
    %cst_8 = arith.constant dense<0.000000e+00> : vector<128x128xf32>
    %9 = tpu.matmul %7, %8, %cst_8 {dimension_numbers = #tpu.dot_dimension_numbers<[1], [0], [0], [1], [0, 0, 1, 1], [], []>} : vector<128x128xf32>, vector<128x128xf32>, vector<128x128xf32> -> vector<128x128xf32>
    %c0_9 = arith.constant 0 : index
    %c0_10 = arith.constant 0 : index
    %10 = vector.load %arg5[%c0_9, %c0_10] : memref<1x128xf32, #tpu.memory_space<vmem>>, vector<1x128xf32>
    %11 = vector.broadcast %10 : vector<1x128xf32> to vector<128x128xf32>
    %12 = arith.addf %9, %11 : vector<128x128xf32>
    %cst_11 = arith.constant 0.000000e+00 : f32
    %13 = vector.broadcast %cst_11 : f32 to vector<128x128xf32>
    %14 = arith.maximumf %12, %13 : vector<128x128xf32>
    %c0_12 = arith.constant 0 : index
    %c0_13 = arith.constant 0 : index
    %15 = vector.load %arg6[%c0_12, %c0_13] : memref<128x128xf32, #tpu.memory_space<vmem>>, vector<128x128xf32>
    %cst_14 = arith.constant dense<0.000000e+00> : vector<128x128xf32>
    %16 = tpu.matmul %14, %15, %cst_14 {dimension_numbers = #tpu.dot_dimension_numbers<[1], [0], [0], [1], [0, 0, 1, 1], [], []>} : vector<128x128xf32>, vector<128x128xf32>, vector<128x128xf32> -> vector<128x128xf32>
    %c0_15 = arith.constant 0 : index
    %c0_16 = arith.constant 0 : index
    %17 = vector.load %arg7[%c0_15, %c0_16] : memref<1x128xf32, #tpu.memory_space<vmem>>, vector<1x128xf32>
    %18 = vector.broadcast %17 : vector<1x128xf32> to vector<128x128xf32>
    %19 = arith.addf %16, %18 : vector<128x128xf32>
    %c0_17 = arith.constant 0 : index
    %c0_18 = arith.constant 0 : index
    %20 = vector.load %arg8[%c0_17, %c0_18] : memref<128x128xf32, #tpu.memory_space<vmem>>, vector<128x128xf32>
    tpu.vector_store %arg8[%c0_17, %c0_18], %19 {strides = array<i32>} : memref<128x128xf32, #tpu.memory_space<vmem>>, vector<128x128xf32>,
    return
  }
  func.func @transform_0(%arg0: i32) -> (i32, i32) {
    %c0_i32 = arith.constant 0 : i32
    %c0_i32_0 = arith.constant 0 : i32
    return %arg0, %c0_i32 : i32, i32
  }
  func.func @transform_1(%arg0: i32) -> (i32, i32) {
    %c0_i32 = arith.constant 0 : i32
    %c0_i32_0 = arith.constant 0 : i32
    %c0_i32_1 = arith.constant 0 : i32
    return %c0_i32, %c0_i32_0 : i32, i32
  }
  func.func @transform_2(%arg0: i32) -> (i32, i32) {
    %c0_i32 = arith.constant 0 : i32
    %c0_i32_0 = arith.constant 0 : i32
    %c0_i32_1 = arith.constant 0 : i32
    return %c0_i32, %c0_i32_0 : i32, i32
  }
  func.func @transform_3(%arg0: i32) -> (i32, i32) {
    %c0_i32 = arith.constant 0 : i32
    %c0_i32_0 = arith.constant 0 : i32
    %c0_i32_1 = arith.constant 0 : i32
    return %c0_i32, %c0_i32_0 : i32, i32
  }
  func.func @transform_4(%arg0: i32) -> (i32, i32) {
    %c0_i32 = arith.constant 0 : i32
    %c0_i32_0 = arith.constant 0 : i32
    %c0_i32_1 = arith.constant 0 : i32
    return %c0_i32, %c0_i32_0 : i32, i32
  }
  func.func @transform_5(%arg0: i32) -> (i32, i32) {
    %c0_i32 = arith.constant 0 : i32
    %c0_i32_0 = arith.constant 0 : i32
    %c0_i32_1 = arith.constant 0 : i32
    return %c0_i32, %c0_i32_0 : i32, i32
  }
  func.func @transform_6(%arg0: i32) -> (i32, i32) {
    %c0_i32 = arith.constant 0 : i32
    %c0_i32_0 = arith.constant 0 : i32
    %c0_i32_1 = arith.constant 0 : i32
    return %c0_i32, %c0_i32_0 : i32, i32
  }
  func.func @transform_7(%arg0: i32) -> (i32, i32) {
    %c0_i32 = arith.constant 0 : i32
    %c0_i32_0 = arith.constant 0 : i32
    return %arg0, %c0_i32 : i32, i32
  }
}

</mosaic_0001>

<bundles_post_ra>
// kernel: mlp_forward.1
= control target key start
LH: loop header
LB: loop body
LE: loop exit
PB: predicated region body
PF: predicated region fallthrough
CT: control target
= control target key end

     0   :  { %s810_s24 = smov 0   ;;  %s1015_s0 = inlined_call_operand.vmem [shape: f32[256,16], index: 0, kind: input, shape index: {}]   ;;  %s1016_s1 = inlined_call_operand.vmem [shape: f32[16,128], index: 1, kind: input, shape index: {}]   ;;  %s1017_s2 = inlined_call_operand.vmem [shape: f32[1,128], index: 2, kind: input, shape index: {}]   ;;  %s1018_s3 = inlined_call_operand.vmem [shape: f32[128,128], index: 3, kind: input, shape index: {}]   ;;  %s1019_s4 = inlined_call_operand.vmem [shape: f32[1,128], index: 4, kind: input, shape index: {}]   ;;  %s1020_s5 = inlined_call_operand.vmem [shape: f32[128,128], index: 5, kind: input, shape index: {}]   ;;  %s1021_s6 = inlined_call_operand.vmem [shape: f32[1,128], index: 6, kind: input, shape index: {}]   ;;  %s1022_s7 = inlined_call_operand.vmem [shape: f32[256,128], index: 7, kind: output, shape index: {}]  }
   0x1 LB: > { %s692_s25 = sadd.s32 4294967295, %s768_s24   ;;  %p696_p0 = scmp.ge.s32.totalorder %s768_s24, 1  ;;  %s768_s24 = sphi %s810_s24, %s17_s24  }
   0x2   : > { %p238_p1 = scmp.lt.s32.totalorder %s768_s24, 3 }
   0x4   : > { %p239_p2 = pnand %p696_p0, %p238_p1 }
   0x5   : > { %s697_s30 = sshll.u32 (!%p239_p2), %s692_s25, 4 }
   0x6   : > { %242 = sbr.rel (%p239_p2) target bundleno = 536 (0x218), region = 48  ;;  %p271_p3 = scmp.lt.s32.totalorder (!%p239_p2), %s697_s30, 31 }
   0xb   : > { %v299_v0 = vld [vmem:[%s1016_s1 + $0x8] sm:$0xff]  ;;  %v298_v1 = vld [vmem:[%s1016_s1] sm:$0xff]  ;;  %s1024_s30 = smov (!%p271_p3, %s697_s30), 31  ;;  %vm304_vm0 = vcmask 130048   ;;  %v449_v11 = vld [vmem:[%s1018_s3 + $0x78] sm:$0xff] }
   0xc   : > { %367 = vmatpush.msra.mxu0 %v299_v0  ;;  %s698_s8 = sshll.u32 %s1024_s30, 3  ;;  %v448_v12 = vld [vmem:[%s1018_s3 + $0x70] sm:$0xff]  ;;  %454 = vmatpush.msra.mxu1 %v449_v11  ;;  %v447_v13 = vld [vmem:[%s1018_s3 + $0x68] sm:$0xff]  ;;  %v446_v15 = vld [vmem:[%s1018_s3 + $0x60] sm:$0xff] }
   0xd   : > { %s832_s11 = scalar_lea.vmem %s1015_s0, %s698_s8  ;;  %719 = vmatpush.msra.mxu3 %v449_v11  ;;  %v445_v16 = vld [vmem:[%s1018_s3 + $0x58] sm:$0xff]  ;;  %v444_v17 = vld [vmem:[%s1018_s3 + $0x50] sm:$0xff]  ;;  %v443_v18 = vld [vmem:[%s1018_s3 + $0x48] sm:$0xff]  ;;  %s994_s26 = scalar_lea.vmem %s1022_s7, %s698_s8 }
   0xe   : > { %368 = vmatpush.msra.mxu0 %v298_v1  ;;  %v282_v2 = vld [vmem:[%s832_s11] sm:$0xff]  ;;  %v283_v3 = vld [vmem:[%s832_s11 + $0x8] sm:$0xff]  ;;  %v284_v4 = vld [vmem:[%s832_s11 + $0x10] sm:$0xff]  ;;  %455 = vmatpush.msra.mxu1 %v448_v12 }
   0xf   : > { %701 = vmatmul.msk.f32.vlgmr.msra.gmra.mxu0 %vm304_vm0, %v282_v2  ;;  %v285_v5 = vld [vmem:[%s832_s11 + $0x18] sm:$0xff]  ;;  %v286_v6 = vld [vmem:[%s832_s11 + $0x20] sm:$0xff]  ;;  %v287_v7 = vld [vmem:[%s832_s11 + $0x28] sm:$0xff]  ;;  %720 = vmatpush.msra.mxu3 %v448_v12 }
  0x10   : > { %v288_v8 = vld [vmem:[%s832_s11 + $0x30] sm:$0xff]  ;;  %v289_v9 = vld [vmem:[%s832_s11 + $0x38] sm:$0xff]  ;;  %v290_v10 = vld [vmem:[%s832_s11 + $0x40] sm:$0xff]  ;;  %456 = vmatpush.msra.mxu1 %v447_v13 }
  0x11   : > { %v291_v14 = vld [vmem:[%s832_s11 + $0x48] sm:$0xff]  ;;  %721 = vmatpush.msra.mxu3 %v447_v13  ;;  %v292_v19 = vld [vmem:[%s832_s11 + $0x50] sm:$0xff]  ;;  %v442_v20 = vld [vmem:[%s1018_s3 + $0x40] sm:$0xff] }
  0x12   : > { %457 = vmatpush.msra.mxu1 %v446_v15  ;;  %v441_v21 = vld [vmem:[%s1018_s3 + $0x38] sm:$0xff]  ;;  %v440_v22 = vld [vmem:[%s1018_s3 + $0x30] sm:$0xff]  ;;  %v439_v23 = vld [vmem:[%s1018_s3 + $0x28] sm:$0xff] }
  0x13   : > { %722 = vmatpush.msra.mxu3 %v446_v15  ;;  %v293_v24 = vld [vmem:[%s832_s11 + $0x58] sm:$0xff]  ;;  %v438_v25 = vld [vmem:[%s1018_s3 + $0x20] sm:$0xff]  ;;  %v436_v27 = vld [vmem:[%s1018_s3 + $0x10] sm:$0xff] }
  0x14   : > { %458 = vmatpush.msra.mxu1 %v445_v16  ;;  %v437_v26 = vld [vmem:[%s1018_s3 + $0x18] sm:$0xff]  ;;  %v294_v28 = vld [vmem:[%s832_s11 + $0x60] sm:$0xff]  ;;  %v435_v29 = vld [vmem:[%s1018_s3 + $0x8] sm:$0xff] }
  0x15   : > { %723 = vmatpush.msra.mxu3 %v445_v16  ;;  %v434_v30 = vld [vmem:[%s1018_s3] sm:$0xff]  ;;  %v295_v31 = vld [vmem:[%s832_s11 + $0x68] sm:$0xff]  ;;  %v296_v32 = vld [vmem:[%s832_s11 + $0x70] sm:$0xff] }
  0x16   : > { %459 = vmatpush.msra.mxu1 %v444_v17  ;;  %v297_v33 = vld [vmem:[%s832_s11 + $0x78] sm:$0xff]  ;;  %v917_v34 = vld [vmem:[%s1017_s2] ss:$0 sm:$0xff]  ;;  %v549_v1 = vld [vmem:[%s1020_s5 + $0x70] sm:$0xff] }
  0x17   : > { %702 = vmatmul.msk.f32.gmra.mxu0 %vm304_vm0, %v283_v3  ;;  %724 = vmatpush.msra.mxu3 %v444_v17  ;;  %v550_v62 = vld [vmem:[%s1020_s5 + $0x78] sm:$0xff]  ;;  %v548_v3 = vld [vmem:[%s1020_s5 + $0x68] sm:$0xff]  ;;  %v543_v11 = vld [vmem:[%s1020_s5 + $0x40] sm:$0xff] }
  0x18   : > { %460 = vmatpush.msra.mxu1 %v443_v18  ;;  %555 = vmatpush.msra.mxu2 %v550_v62  ;;  %v542_v12 = vld [vmem:[%s1020_s5 + $0x38] sm:$0xff]  ;;  %v541_v15 = vld [vmem:[%s1020_s5 + $0x30] sm:$0xff]  ;;  %v540_v17 = vld [vmem:[%s1020_s5 + $0x28] sm:$0xff] }
  0x19   : > { %725 = vmatpush.msra.mxu3 %v443_v18  ;;  %v539_v18 = vld [vmem:[%s1020_s5 + $0x20] sm:$0xff] }
  0x1a   : > { %461 = vmatpush.msra.mxu1 %v442_v20  ;;  %556 = vmatpush.msra.mxu2 %v549_v1 }
  0x1b   : > { %726 = vmatpush.msra.mxu3 %v442_v20 }
  0x1c   : > { %462 = vmatpush.msra.mxu1 %v441_v21  ;;  %557 = vmatpush.msra.mxu2 %v548_v3 }
  0x1d   : > { %727 = vmatpush.msra.mxu3 %v441_v21 }
  0x1e   : > { %463 = vmatpush.msra.mxu1 %v440_v22 }
  0x1f   : > { %703 = vmatmul.msk.f32.gmra.mxu0 %vm304_vm0, %v284_v4  ;;  %728 = vmatpush.msra.mxu3 %v440_v22  ;;  %v547_v4 = vld [vmem:[%s1020_s5 + $0x60] sm:$0xff]  ;;  %v537_v22 = vld [vmem:[%s1020_s5 + $0x10] sm:$0xff] }
  0x20   : > { %464 = vmatpush.msra.mxu1 %v439_v23  ;;  %558 = vmatpush.msra.mxu2 %v547_v4 }
  0x21   : > { %729 = vmatpush.msra.mxu3 %v439_v23 }
  0x22   : > { %465 = vmatpush.msra.mxu1 %v438_v25 }
  0x23   : > { %730 = vmatpush.msra.mxu3 %v438_v25  ;;  %v535_v25 = vld [vmem:[%s1020_s5] sm:$0xff] }
  0x24   : > { %466 = vmatpush.msra.mxu1 %v437_v26 }
  0x25   : > { %731 = vmatpush.msra.mxu3 %v437_v26 }
  0x26   : > { %467 = vmatpush.msra.mxu1 %v436_v27 }
  0x27   : > { %704 = vmatmul.msk.f32.gmra.mxu0 %vm304_vm0, %v285_v5  ;;  %732 = vmatpush.msra.mxu3 %v436_v27  ;;  %v546_v5 = vld [vmem:[%s1020_s5 + $0x58] sm:$0xff] }
  0x28   : > { %468 = vmatpush.msra.mxu1 %v435_v29  ;;  %559 = vmatpush.msra.mxu2 %v546_v5 }
  0x29   : > { %733 = vmatpush.msra.mxu3 %v435_v29 }
  0x2a   : > { %469 = vmatpush.msra.mxu1 %v434_v30 }
  0x2b   : > { %734 = vmatpush.msra.mxu3 %v434_v30 }
  0x2d   : > { %735 = vmatpush.msrb.mxu3 %v550_v62 }
  0x2f   : > { %705 = vmatmul.msk.f32.gmra.mxu0 %vm304_vm0, %v286_v6  ;;  %736 = vmatpush.msrb.mxu3 %v549_v1 }
  0x31   : > { %737 = vmatpush.msrb.mxu3 %v548_v3 }
  0x33   : > { %738 = vmatpush.msrb.mxu3 %v547_v4 }
  0x35   : > { %739 = vmatpush.msrb.mxu3 %v546_v5 }
  0x37   : > { %706 = vmatmul.msk.f32.gmra.mxu0 %vm304_vm0, %v287_v7 }
  0x3f   : > { %707 = vmatmul.msk.f32.gmra.mxu0 %vm304_vm0, %v288_v8  ;;  %v545_v8 = vld [vmem:[%s1020_s5 + $0x50] sm:$0xff] }
  0x40   : > { %560 = vmatpush.msra.mxu2 %v545_v8  ;;  %740 = vmatpush.msrb.mxu3 %v545_v8 }
  0x47   : > { %708 = vmatmul.msk.f32.gmra.mxu0 %vm304_vm0, %v289_v9 }
  0x4f   : > { %709 = vmatmul.msk.f32.gmra.mxu0 %vm304_vm0, %v290_v10  ;;  %v544_v10 = vld [vmem:[%s1020_s5 + $0x48] sm:$0xff] }
  0x50   : > { %561 = vmatpush.msra.mxu2 %v544_v10  ;;  %741 = vmatpush.msrb.mxu3 %v544_v10 }
  0x52   : > { %562 = vmatpush.msra.mxu2 %v543_v11  ;;  %742 = vmatpush.msrb.mxu3 %v543_v11 }
  0x54   : > { %563 = vmatpush.msra.mxu2 %v542_v12  ;;  %743 = vmatpush.msrb.mxu3 %v542_v12 }
  0x56   : > { %564 = vmatpush.msra.mxu2 %v541_v15  ;;  %744 = vmatpush.msrb.mxu3 %v541_v15 }
  0x57   : > { %710 = vmatmul.msk.f32.gmra.mxu0 %vm304_vm0, %v291_v14 }
  0x58   : > { %565 = vmatpush.msra.mxu2 %v540_v17  ;;  %745 = vmatpush.msrb.mxu3 %v540_v17 }
  0x5a   : > { %566 = vmatpush.msra.mxu2 %v539_v18  ;;  %746 = vmatpush.msrb.mxu3 %v539_v18 }
  0x5f   : > { %711 = vmatmul.msk.f32.gmra.mxu0 %vm304_vm0, %v292_v19  ;;  %v538_v19 = vld [vmem:[%s1020_s5 + $0x18] sm:$0xff] }
  0x60   : > { %567 = vmatpush.msra.mxu2 %v538_v19  ;;  %747 = vmatpush.msrb.mxu3 %v538_v19 }
  0x62   : > { %568 = vmatpush.msra.mxu2 %v537_v22  ;;  %748 = vmatpush.msrb.mxu3 %v537_v22 }
  0x67   : > { %712 = vmatmul.msk.f32.gmra.mxu0 %vm304_vm0, %v293_v24  ;;  %v536_v24 = vld [vmem:[%s1020_s5 + $0x8] sm:$0xff] }
  0x68   : > { %569 = vmatpush.msra.mxu2 %v536_v24  ;;  %749 = vmatpush.msrb.mxu3 %v536_v24 }
  0x6a   : > { %570 = vmatpush.msra.mxu2 %v535_v25  ;;  %750 = vmatpush.msrb.mxu3 %v535_v25 }
  0x6f   : > { %713 = vmatmul.msk.f32.gmra.mxu0 %vm304_vm0, %v294_v28 }
  0x77   : > { %714 = vmatmul.msk.f32.gmra.mxu0 %vm304_vm0, %v295_v31 }
  0x7f   : > { %715 = vmatmul.msk.f32.gmra.mxu0 %vm304_vm0, %v296_v32 }
  0x87   : > { %716 = vmatmul.msk.f32.gmra.mxu0 %vm304_vm0, %v297_v33 }
  0x8c   : > { %v370_v35 = vpop.f32.mrf.mxu0 }
  0x8d   : > { %v371_v36 = vadd.f32 %v917_v34, %v370_v35 }
  0x8f   : > { %v418_v37 = vmax.f32 %v371_v36, 0.0  ;;  %v760_v36 = vld [vmem:[%s1019_s4] ss:$0 sm:$0xff] }
  0x91   : > { %470 = vmatmul.f32.vlgmr.msra.gmra.mxu1 %v418_v37 }
  0x94   : > { %v373_v38 = vpop.f32.mrf.mxu0 }
  0x95   : > { %v374_v39 = vadd.f32 %v917_v34, %v373_v38 }
  0x97   : > { %v419_v40 = vmax.f32 %v374_v39, 0.0 }
  0x99   : > { %473 = vmatmul.f32.gmra.mxu1 %v419_v40 }
  0x9c   : > { %v376_v41 = vpop.f32.mrf.mxu0 }
  0x9d   : > { %v377_v42 = vadd.f32 %v917_v34, %v376_v41 }
  0x9f   : > { %v420_v43 = vmax.f32 %v377_v42, 0.0 }
  0xa1   : > { %476 = vmatmul.f32.gmra.mxu1 %v420_v43 }
  0xa4   : > { %v379_v44 = vpop.f32.mrf.mxu0 }
  0xa5   : > { %v380_v45 = vadd.f32 %v917_v34, %v379_v44 }
  0xa7   : > { %v421_v46 = vmax.f32 %v380_v45, 0.0 }
  0xa9   : > { %479 = vmatmul.f32.gmra.mxu1 %v421_v46 }
  0xac   : > { %v382_v47 = vpop.f32.mrf.mxu0 }
  0xad   : > { %v383_v48 = vadd.f32 %v917_v34, %v382_v47 }
  0xaf   : > { %v422_v49 = vmax.f32 %v383_v48, 0.0 }
  0xb1   : > { %482 = vmatmul.f32.gmra.mxu1 %v422_v49 }
  0xb4   : > { %v385_v50 = vpop.f32.mrf.mxu0 }
  0xb5   : > { %v386_v51 = vadd.f32 %v917_v34, %v385_v50 }
  0xb7   : > { %v423_v52 = vmax.f32 %v386_v51, 0.0 }
  0xb9   : > { %485 = vmatmul.f32.gmra.mxu1 %v423_v52 }
  0xbc   : > { %v388_v53 = vpop.f32.mrf.mxu0 }
  0xbd   : > { %v389_v54 = vadd.f32 %v917_v34, %v388_v53 }
  0xbf   : > { %v424_v55 = vmax.f32 %v389_v54, 0.0 }
  0xc1   : > { %488 = vmatmul.f32.gmra.mxu1 %v424_v55 }
  0xc4   : > { %v391_v56 = vpop.f32.mrf.mxu0 }
  0xc5   : > { %v392_v57 = vadd.f32 %v917_v34, %v391_v56 }
  0xc7   : > { %v425_v58 = vmax.f32 %v392_v57, 0.0 }
  0xc9   : > { %491 = vmatmul.f32.gmra.mxu1 %v425_v58 }
  0xcc   : > { %v394_v59 = vpop.f32.mrf.mxu0 }
  0xcd   : > { %v395_v60 = vadd.f32 %v917_v34, %v394_v59 }
  0xcf   : > { %v426_v61 = vmax.f32 %v395_v60, 0.0 }
  0xd1   : > { %494 = vmatmul.f32.gmra.mxu1 %v426_v61 }
  0xd4   : > { %v397_v63 = vpop.f32.mrf.mxu0 }
  0xd5   : > { %v398_v0 = vadd.f32 %v917_v34, %v397_v63 }
  0xd7   : > { %v427_v2 = vmax.f32 %v398_v0, 0.0 }
  0xd9   : > { %497 = vmatmul.f32.gmra.mxu1 %v427_v2 }
  0xdc   : > { %v400_v6 = vpop.f32.mrf.mxu0 }
  0xdd   : > { %v401_v7 = vadd.f32 %v917_v34, %v400_v6 }
  0xdf   : > { %v428_v9 = vmax.f32 %v401_v7, 0.0 }
  0xe1   : > { %500 = vmatmul.f32.gmra.mxu1 %v428_v9 }
  0xe4   : > { %v403_v13 = vpop.f32.mrf.mxu0 }
  0xe5   : > { %v404_v14 = vadd.f32 %v917_v34, %v403_v13 }
  0xe7   : > { %v429_v16 = vmax.f32 %v404_v14, 0.0 }
  0xe9   : > { %503 = vmatmul.f32.gmra.mxu1 %v429_v16 }
  0xec   : > { %v406_v20 = vpop.f32.mrf.mxu0 }
  0xed   : > { %v407_v21 = vadd.f32 %v917_v34, %v406_v20  ;;  %v761_v20 = vld [vmem:[%s1021_s6] ss:$0 sm:$0xff] }
  0xef   : > { %v430_v23 = vmax.f32 %v407_v21, 0.0 }
  0xf1   : > { %506 = vmatmul.f32.vlgmr.msra.gmra.mxu3 %v430_v23 }
  0xf4   : > { %v409_v26 = vpop.f32.mrf.mxu0 }
  0xf5   : > { %v410_v27 = vadd.f32 %v917_v34, %v409_v26 }
  0xf7   : > { %v431_v28 = vmax.f32 %v410_v27, 0.0 }
  0xf9   : > { %509 = vmatmul.f32.gmra.mxu3 %v431_v28 }
  0xfc   : > { %v412_v29 = vpop.f32.mrf.mxu0 }
  0xfd   : > { %v413_v30 = vadd.f32 %v917_v34, %v412_v29 }
  0xff   : > { %v432_v31 = vmax.f32 %v413_v30, 0.0 }
 0x101   : > { %512 = vmatmul.f32.gmra.mxu3 %v432_v31 }
 0x104   : > { %v415_v32 = vpop.f32.mrf.mxu0 }
 0x105   : > { %v416_v33 = vadd.f32 %v917_v34, %v415_v32 }
 0x107   : > { %v433_v35 = vmax.f32 %v416_v33, 0.0 }
 0x109   : > { %515 = vmatmul.f32.gmra.mxu3 %v433_v35 }
 0x10e   : > { %v471_v37 = vpop.f32.mrf.mxu1 }
 0x10f   : > { %v472_v38 = vadd.f32 %v760_v36, %v471_v37 }
 0x111   : > { %v519_v39 = vmax.f32 %v472_v38, 0.0 }
 0x113   : > { %571 = vmatmul.f32.vlgmr.msra.gmra.mxu2 %v519_v39 }
 0x116   : > { %v474_v40 = vpop.f32.mrf.mxu1 }
 0x117   : > { %v475_v41 = vadd.f32 %v760_v36, %v474_v40 }
 0x119   : > { %v520_v42 = vmax.f32 %v475_v41, 0.0 }
 0x11b   : > { %574 = vmatmul.f32.gmra.mxu2 %v520_v42 }
 0x11e   : > { %v477_v43 = vpop.f32.mrf.mxu1 }
 0x11f   : > { %v478_v44 = vadd.f32 %v760_v36, %v477_v43 }
 0x121   : > { %v521_v45 = vmax.f32 %v478_v44, 0.0 }
 0x123   : > { %577 = vmatmul.f32.gmra.mxu2 %v521_v45 }
 0x126   : > { %v480_v46 = vpop.f32.mrf.mxu1 }
 0x127   : > { %v481_v34 = vadd.f32 %v760_v36, %v480_v46 }
 0x129   : > { %v522_v47 = vmax.f32 %v481_v34, 0.0 }
 0x12b   : > { %580 = vmatmul.f32.gmra.mxu2 %v522_v47 }
 0x12e   : > { %v483_v48 = vpop.f32.mrf.mxu1 }
 0x12f   : > { %v484_v49 = vadd.f32 %v760_v36, %v483_v48 }
 0x131   : > { %v523_v50 = vmax.f32 %v484_v49, 0.0 }
 0x133   : > { %583 = vmatmul.f32.gmra.mxu2 %v523_v50 }
 0x136   : > { %v486_v51 = vpop.f32.mrf.mxu1 }
 0x137   : > { %v487_v52 = vadd.f32 %v760_v36, %v486_v51 }
 0x139   : > { %v524_v53 = vmax.f32 %v487_v52, 0.0 }
 0x13b   : > { %586 = vmatmul.f32.gmra.mxu2 %v524_v53 }
 0x13e   : > { %v489_v54 = vpop.f32.mrf.mxu1 }
 0x13f   : > { %v490_v55 = vadd.f32 %v760_v36, %v489_v54 }
 0x141   : > { %v525_v56 = vmax.f32 %v490_v55, 0.0 }
 0x143   : > { %589 = vmatmul.f32.gmra.mxu2 %v525_v56 }
 0x146   : > { %v492_v57 = vpop.f32.mrf.mxu1 }
 0x147   : > { %v493_v58 = vadd.f32 %v760_v36, %v492_v57 }
 0x149   : > { %v526_v59 = vmax.f32 %v493_v58, 0.0 }
 0x14b   : > { %592 = vmatmul.f32.gmra.mxu2 %v526_v59 }
 0x14e   : > { %v495_v60 = vpop.f32.mrf.mxu1 }
 0x14f   : > { %v496_v61 = vadd.f32 %v760_v36, %v495_v60 }
 0x151   : > { %v527_v62 = vmax.f32 %v496_v61, 0.0 }
 0x153   : > { %595 = vmatmul.f32.gmra.mxu2 %v527_v62 }
 0x156   : > { %v498_v63 = vpop.f32.mrf.mxu1 }
 0x157   : > { %v499_v0 = vadd.f32 %v760_v36, %v498_v63 }
 0x159   : > { %v528_v1 = vmax.f32 %v499_v0, 0.0 }
 0x15b   : > { %598 = vmatmul.f32.gmra.mxu2 %v528_v1 }
 0x15e   : > { %v501_v2 = vpop.f32.mrf.mxu1 }
 0x15f   : > { %v502_v3 = vadd.f32 %v760_v36, %v501_v2 }
 0x161   : > { %v529_v4 = vmax.f32 %v502_v3, 0.0 }
 0x163   : > { %601 = vmatmul.f32.gmra.mxu2 %v529_v4 }
 0x166   : > { %v504_v5 = vpop.f32.mrf.mxu1 }
 0x167   : > { %v505_v6 = vadd.f32 %v760_v36, %v504_v5 }
 0x169   : > { %v530_v7 = vmax.f32 %v505_v6, 0.0 }
 0x16b   : > { %604 = vmatmul.f32.gmra.mxu2 %v530_v7 }
 0x174   : > { %v507_v8 = vpop.f32.mrf.mxu3 }
 0x175   : > { %v508_v9 = vadd.f32 %v760_v36, %v507_v8 }
 0x177   : > { %v531_v10 = vmax.f32 %v508_v9, 0.0 }
 0x179   : > { %607 = vmatmul.f32.vlgmr.msrb.gmra.mxu3 %v531_v10 }
 0x17c   : > { %v510_v11 = vpop.f32.mrf.mxu3 }
 0x17d   : > { %v511_v12 = vadd.f32 %v760_v36, %v510_v11 }
 0x17f   : > { %v532_v13 = vmax.f32 %v511_v12, 0.0 }
 0x181   : > { %610 = vmatmul.f32.gmra.mxu3 %v532_v13 }
 0x184   : > { %v513_v14 = vpop.f32.mrf.mxu3 }
 0x185   : > { %v514_v15 = vadd.f32 %v760_v36, %v513_v14 }
 0x187   : > { %v533_v16 = vmax.f32 %v514_v15, 0.0 }
 0x189   : > { %613 = vmatmul.f32.gmra.mxu3 %v533_v16 }
 0x18c   : > { %v516_v17 = vpop.f32.mrf.mxu3 }
 0x18d   : > { %v517_v18 = vadd.f32 %v760_v36, %v516_v17 }
 0x18f   : > { %v534_v19 = vmax.f32 %v517_v18, 0.0 }
 0x191   : > { %616 = vmatmul.f32.gmra.mxu3 %v534_v19 }
 0x196   : > { %v572_v21 = vpop.f32.mrf.mxu2 }
 0x197   : > { %v573_v22 = vadd.f32 %v761_v20, %v572_v21 }
 0x199   : > { %620 = vst [vmem:[%s994_s26] sm:$0xff] %v573_v22 }
 0x19e   : > { %v575_v23 = vpop.f32.mrf.mxu2 }
 0x19f   : > { %v576_v24 = vadd.f32 %v761_v20, %v575_v23 }
 0x1a1   : > { %621 = vst [vmem:[%s994_s26 + $0x8] sm:$0xff] %v576_v24 }
 0x1a6   : > { %v578_v25 = vpop.f32.mrf.mxu2 }
 0x1a7   : > { %v579_v26 = vadd.f32 %v761_v20, %v578_v25 }
 0x1a9   : > { %622 = vst [vmem:[%s994_s26 + $0x10] sm:$0xff] %v579_v26 }
 0x1ae   : > { %v581_v27 = vpop.f32.mrf.mxu2 }
 0x1af   : > { %v582_v28 = vadd.f32 %v761_v20, %v581_v27 }
 0x1b1   : > { %623 = vst [vmem:[%s994_s26 + $0x18] sm:$0xff] %v582_v28 }
 0x1b6   : > { %v584_v29 = vpop.f32.mrf.mxu2 }
 0x1b7   : > { %v585_v30 = vadd.f32 %v761_v20, %v584_v29 }
 0x1b9   : > { %624 = vst [vmem:[%s994_s26 + $0x20] sm:$0xff] %v585_v30 }
 0x1be   : > { %v587_v31 = vpop.f32.mrf.mxu2 }
 0x1bf   : > { %v588_v32 = vadd.f32 %v761_v20, %v587_v31 }
 0x1c1   : > { %625 = vst [vmem:[%s994_s26 + $0x28] sm:$0xff] %v588_v32 }
 0x1c6   : > { %v590_v33 = vpop.f32.mrf.mxu2 }
 0x1c7   : > { %v591_v35 = vadd.f32 %v761_v20, %v590_v33 }
 0x1c9   : > { %626 = vst [vmem:[%s994_s26 + $0x30] sm:$0xff] %v591_v35 }
 0x1ce   : > { %v593_v36 = vpop.f32.mrf.mxu2 }
 0x1cf   : > { %v594_v37 = vadd.f32 %v761_v20, %v593_v36 }
 0x1d1   : > { %627 = vst [vmem:[%s994_s26 + $0x38] sm:$0xff] %v594_v37 }
 0x1d6   : > { %v596_v38 = vpop.f32.mrf.mxu2 }
 0x1d7   : > { %v597_v39 = vadd.f32 %v761_v20, %v596_v38 }
 0x1d9   : > { %628 = vst [vmem:[%s994_s26 + $0x40] sm:$0xff] %v597_v39 }
 0x1de   : > { %v599_v40 = vpop.f32.mrf.mxu2 }
 0x1df   : > { %v600_v41 = vadd.f32 %v761_v20, %v599_v40 }
 0x1e1   : > { %629 = vst [vmem:[%s994_s26 + $0x48] sm:$0xff] %v600_v41 }
 0x1e6   : > { %v602_v42 = vpop.f32.mrf.mxu2 }
 0x1e7   : > { %v603_v43 = vadd.f32 %v761_v20, %v602_v42 }
 0x1e9   : > { %630 = vst [vmem:[%s994_s26 + $0x50] sm:$0xff] %v603_v43 }
 0x1ee   : > { %v605_v44 = vpop.f32.mrf.mxu2 }
 0x1ef   : > { %v606_v45 = vadd.f32 %v761_v20, %v605_v44 }
 0x1f1   : > { %631 = vst [vmem:[%s994_s26 + $0x58] sm:$0xff] %v606_v45 }
 0x1fc   : > { %v608_v46 = vpop.f32.mrf.mxu3 }
 0x1fd   : > { %v609_v34 = vadd.f32 %v761_v20, %v608_v46 }
 0x1ff   : > { %632 = vst [vmem:[%s994_s26 + $0x60] sm:$0xff] %v609_v34 }
 0x204   : > { %v611_v47 = vpop.f32.mrf.mxu3 }
 0x205   : > { %v612_v48 = vadd.f32 %v761_v20, %v611_v47 }
 0x207   : > { %633 = vst [vmem:[%s994_s26 + $0x68] sm:$0xff] %v612_v48 }
 0x20c   : > { %v614_v49 = vpop.f32.mrf.mxu3 }
 0x20d   : > { %v615_v50 = vadd.f32 %v761_v20, %v614_v49 }
 0x20f   : > { %634 = vst [vmem:[%s994_s26 + $0x70] sm:$0xff] %v615_v50 }
 0x214   : > { %v617_v51 = vpop.f32.mrf.mxu3 }
 0x215   : > { %v618_v52 = vadd.f32 %v761_v20, %v617_v51 }
 0x217   : > { %635 = vst [vmem:[%s994_s26 + $0x78] sm:$0xff] %v618_v52 }
 0x218 PF: > { %s17_s24 = sadd.s32 1, %s768_s24  }
 0x219   : > { %p14_p4 = scmp.ge.s32.totalorder %s17_s24, 4  }
 0x21b   :  { %16 = sbr.rel (!%p14_p4) target bundleno = 1 (0x1), region = 78 }

</bundles_post_ra>
